<compile_context>
chip_gen: v5e
topology: v5e:2x2
jax: 0.10.0
libtpu: 0.0.40
codegen_flags: <defaults>
</compile_context>

<pallas_src>
import numpy as np
import jax
import jax.numpy as jnp
from jax.experimental import pallas as pl
from jax.experimental.pallas import tpu as pltpu

EPS = 1e-4                      # args.bnArgs['eps']
VMEM_LIMIT = 32 * 1024 * 1024   # safe on v5e/v6e/v7x; tiles here are far smaller


# ---------------------------------------------------------------------------
# Shared in-kernel conv builder:
#   nearest-x`sf` upsample + zero pad + 3x3 'same' conv + crop, all in the
#   channels-on-sublane / flat-spatial-on-lane layout.
# ---------------------------------------------------------------------------
def _make_conv_builder(Hx, Wx, Hy, Wy, Cin, Cout, sf):
    S = Hy * Wy               # compact output spatial length (lane-dense)
    L = (Hy + 2) * Wy         # flat row-padded buffer length (row stride = Wy)
    Hu = sf * Hx              # upsampled height

    def build_conv(x2, wrep, w9_ref, msk):
        # x2    : (Hx*Cin, Wx) value, rows ordered (input-row, channel)
        # wrep  : (Wx, Wy)     0/1 width nearest-replication matrix (tiny const)
        # w9_ref: (9, Cout, Cin) ref, taps ordered (ky, kx)
        # msk   : (2, L)       post-roll column edge masks [left-tap, right-tap]

        # 1) Width upsample: one small MXU matmul (M = Hx*Cin).
        xw = jnp.dot(x2, wrep, preferred_element_type=jnp.float32)   # (Hx*Cin, Wy)

        # 2) Row replication + zero row padding, assembled directly in the flat
        #    (channel, row*Wy + col) layout.  O(Cin*L) copies, no O(S^2) matrix.
        pieces = [jnp.zeros((Cin, Wy), jnp.float32)]                 # top pad row
        for p in range(Hx):
            slab = xw[p * Cin:(p + 1) * Cin, :]                      # (Cin, Wy)
            pieces.extend([slab] * sf)                               # sf output rows
        tail = (Hy + 2) - (1 + Hu)                                   # bottom pad rows
        if tail > 0:
            pieces.append(jnp.zeros((Cin, tail * Wy), jnp.float32))
        buf = jnp.concatenate(pieces, axis=1)[:, :L]                 # (Cin, L)

        # 3) The 9 conv taps are uniform shifts on the flat lane axis: XLU rolls
        #    (+ post-roll column-edge masks), each contracted with a small
        #    accumulating MXU matmul.  No (9*Cin, L) im2col scratch.
        conv = None
        for ky in range(3):
            for kx in range(3):
                d = ky * Wy + kx - 1                                 # flat tap offset
                tap = buf if d == 0 else pltpu.roll(buf, shift=(-d) % L, axis=1)
                if kx == 0:
                    tap = tap * msk[0:1, :]      # left tap: zero at output col 0
                elif kx == 2:
                    tap = tap * msk[1:2, :]      # right tap: zero at output col Wy-1
                prod = jnp.dot(w9_ref[ky * 3 + kx], tap,
                               preferred_element_type=jnp.float32)   # (Cout, L)
                conv = prod if conv is None else conv + prod
        return conv[:, :S]                                           # crop = free prefix slice

    return build_conv


# ---------------------------------------------------------------------------
# Pass 1: stats-only kernel.  Emits per-batch [sum, centered sum-of-squares]
# for the conv channels AND the skip channels.  No conv HBM intermediate.
# ---------------------------------------------------------------------------
def _make_stats_kernel(Hx, Wx, Hy, Wy, Cin, Cout, Cy, sf):
    S = Hy * Wy
    inv_S = 1.0 / float(S)
    build_conv = _make_conv_builder(Hx, Wx, Hy, Wy, Cin, Cout, sf)

    def kernel(x_ref, y_ref, wrep_ref, w9_ref, msk_ref, stats_ref):
        conv = build_conv(x_ref[0], wrep_ref[...], w9_ref, msk_ref[...])  # (Cout, S)
        y = y_ref[0]                                                      # (Cy, S)

        c_sum = jnp.sum(conv, axis=1, keepdims=True)
        c_css = jnp.sum(jnp.square(conv - c_sum * inv_S), axis=1, keepdims=True)
        y_sum = jnp.sum(y, axis=1, keepdims=True)
        y_css = jnp.sum(jnp.square(y - y_sum * inv_S), axis=1, keepdims=True)

        stats_ref[0, 0:Cout, 0:1] = c_sum
        stats_ref[0, 0:Cout, 1:2] = c_css
        stats_ref[0, Cout:Cout + Cy, 0:1] = y_sum
        stats_ref[0, Cout:Cout + Cy, 1:2] = y_css

    return kernel


# ---------------------------------------------------------------------------
# Pass 2: recompute the cheap conv, apply BatchNorm scale/shift + ReLU, and
# write the conv half / skip half into disjoint channel slabs (no concat copy).
# ---------------------------------------------------------------------------
def _make_fused_kernel(Hx, Wx, Hy, Wy, Cin, Cout, Cy, sf):
    Ctot = Cout + Cy
    build_conv = _make_conv_builder(Hx, Wx, Hy, Wy, Cin, Cout, sf)

    def kernel(x_ref, y_ref, wrep_ref, w9_ref, msk_ref, sc_ref, sh_ref, o_ref):
        conv = build_conv(x_ref[0], wrep_ref[...], w9_ref, msk_ref[...])  # (Cout, S)
        sc = sc_ref[...]
        sh = sh_ref[...]
        # Cout is a multiple of 8 (f32 sublane tile), so both slab stores are
        # sublane-aligned and the S-wide lane axis keeps the stores dense.
        o_ref[0, 0:Cout, :] = jnp.maximum(conv * sc[0:Cout, :] + sh[0:Cout, :], 0.0)
        o_ref[0, Cout:Ctot, :] = jnp.maximum(
            y_ref[0] * sc[Cout:Ctot, :] + sh[Cout:Ctot, :], 0.0)

    return kernel


def decode_sub_block(x_in, y_in, params, scale_factor=2):
    """DecodeSubBlock forward.  x_in / y_in / output are NCHW, like PyTorch."""
    w = params["conv_w"]                              # (Cout, Cin, 3, 3)
    # params["conv_b"] is intentionally unused: training-mode BatchNorm over
    # the conv channels is invariant to a per-channel pre-BN constant.
    gamma, beta = params["gamma"], params["beta"]     # (Ctot,), (Ctot,)

    N, Cx, Hx, Wx = x_in.shape
    _, Cy, Hy, Wy = y_in.shape
    Cout = w.shape[0]
    Ctot = Cout + Cy
    sf = scale_factor if scale_factor > 1 else 1
    Hu, Wu = sf * Hx, sf * Wx
    # The lane-roll wraparound is only safe under this guard (out-of-range taps
    # land on the zero pad row or on masked edge columns).
    if Wu != Wy or Hu < Hy:
        raise NotImplementedError("decode_sub_block expects sf*Wx == Wy and sf*Hx >= Hy")

    S = Hy * Wy
    L = (Hy + 2) * Wy

    # Lane-dense views.  x is reordered to (input-row, channel) on sublanes so
    # the in-kernel row replication is a contiguous sublane slice per row
    # (one cheap XLA transpose of the smallest tensor); y is a free reshape.
    x_t = jnp.transpose(x_in, (0, 2, 1, 3)).reshape(N, Hx * Cx, Wx).astype(jnp.float32)
    y_f = y_in.reshape(N, Cy, S).astype(jnp.float32)

    # --- small host-side constants (all O(Wx*Wy + L), never O(S^2)) ---
    wrep_np = np.zeros((Wx, Wy), np.float32)
    wrep_np[np.arange(Wy) // sf, np.arange(Wy)] = 1.0     # width nearest-replication
    wrep = jnp.asarray(wrep_np)

    col = np.arange(L) % Wy
    msk = jnp.asarray(np.stack([(col != 0), (col != Wy - 1)]).astype(np.float32))

    # Conv weights (Cout, Cin, 3, 3) -> (9, Cout, Cin), taps ordered (ky, kx).
    w9 = jnp.transpose(w, (2, 3, 0, 1)).reshape(9, Cout, Cx).astype(jnp.float32)

    cparams = pltpu.CompilerParams(dimension_semantics=("parallel",),
                                   vmem_limit_bytes=VMEM_LIMIT)

    # Constant operands are tiny (KBs), so default double-buffering is
    # negligible at these sizes (see TODO about Buffered(1) for production).
    const_specs = [
        pl.BlockSpec((Wx, Wy), lambda n: (0, 0)),
        pl.BlockSpec((9, Cout, Cx), lambda n: (0, 0, 0)),
        pl.BlockSpec((2, L), lambda n: (0, 0)),
    ]

    # --- pass 1: per-batch centered moments of conv + skip channels ---
    stats = pl.pallas_call(
        _make_stats_kernel(Hx, Wx, Hy, Wy, Cx, Cout, Cy, sf),
        out_shape=jax.ShapeDtypeStruct((N, Ctot, 2), jnp.float32),
        grid=(N,),
        in_specs=[pl.BlockSpec((1, Hx * Cx, Wx), lambda n: (n, 0, 0)),
                  pl.BlockSpec((1, Cy, S), lambda n: (n, 0, 0))] + const_specs,
        out_specs=pl.BlockSpec((1, Ctot, 2), lambda n: (n, 0, 0)),
        compiler_params=cparams,
    )(x_t, y_f, wrep, w9, msk)

    # --- finish BatchNorm batch statistics on tiny (N, Ctot) arrays (XLA) ---
    # Chan's parallel-variance combination of per-batch centered moments:
    # numerically robust (no E[x^2] - E[x]^2 cancellation).
    cnt_b = float(S)
    sum_b = stats[:, :, 0]                                # (N, Ctot)
    css_b = stats[:, :, 1]
    mean_b = sum_b / cnt_b
    mean = jnp.sum(sum_b, axis=0) / (N * cnt_b)           # (Ctot,)
    m2 = jnp.sum(css_b, axis=0) + cnt_b * jnp.sum(jnp.square(mean_b - mean), axis=0)
    var = m2 / (N * cnt_b)                                # biased (training BN)
    inv = jax.lax.rsqrt(var + EPS)
    g = gamma.astype(jnp.float32)
    bn_scale = (g * inv).reshape(Ctot, 1)
    bn_shift = (beta.astype(jnp.float32) - mean * g * inv).reshape(Ctot, 1)

    # --- pass 2: fused conv recompute + BN + ReLU + slab-concat ---
    out_flat = pl.pallas_call(
        _make_fused_kernel(Hx, Wx, Hy, Wy, Cx, Cout, Cy, sf),
        out_shape=jax.ShapeDtypeStruct((N, Ctot, S), jnp.float32),
        grid=(N,),
        in_specs=[pl.BlockSpec((1, Hx * Cx, Wx), lambda n: (n, 0, 0)),
                  pl.BlockSpec((1, Cy, S), lambda n: (n, 0, 0))] + const_specs + [
                  pl.BlockSpec((Ctot, 1), lambda n: (0, 0)),
                  pl.BlockSpec((Ctot, 1), lambda n: (0, 0))],
        out_specs=pl.BlockSpec((1, Ctot, S), lambda n: (n, 0, 0)),
        compiler_params=cparams,
    )(x_t, y_f, wrep, w9, msk, bn_scale, bn_shift)

    return out_flat.reshape(N, Ctot, Hy, Wy)


def _reference(x_in, y_in, params, scale_factor=2):
    """Pure-JAX reference (independent of the Pallas path) for verification."""
    w, b = params["conv_w"], params["conv_b"]
    gamma, beta = params["gamma"], params["beta"]
    x = jnp.transpose(x_in, (0, 2, 3, 1))
    y = jnp.transpose(y_in, (0, 2, 3, 1))
    if scale_factor > 1:
        x = jnp.repeat(jnp.repeat(x, scale_factor, axis=1), scale_factor, axis=2)
    conv = jax.lax.conv_general_dilated(
        x, jnp.transpose(w, (2, 3, 1, 0)),
        window_strides=(1, 1), padding=((1, 1), (1, 1)),
        dimension_numbers=("NHWC", "HWIO", "NHWC"))
    conv = conv + b[None, None, None, :]
    Hy, Wy = y.shape[1], y.shape[2]
    conv = conv[:, :Hy, :Wy, :]
    z = jnp.concatenate([conv, y], axis=-1)
    mean = jnp.mean(z, axis=(0, 1, 2), keepdims=True)
    var = jnp.mean((z - mean) ** 2, axis=(0, 1, 2), keepdims=True)
    out = (z - mean) * jax.lax.rsqrt(var + EPS) * gamma + beta
    out = jnp.maximum(out, 0.0)
    return jnp.transpose(out, (0, 3, 1, 2))


if __name__ == "__main__":
    key = jax.random.PRNGKey(0)
    k_x, k_y, k_w, k_b, k_g, k_be = jax.random.split(key, 6)

    # Small shapes: x_in is the lower-res decoder feature, y_in the skip tensor.
    N, Cx, Hx, Wx = 2, 4, 8, 8
    Cy, Hy, Wy = 4, 16, 16
    num_filters = 8
    Ctot = num_filters + Cy

    x_in = jax.random.normal(k_x, (N, Cx, Hx, Wx), jnp.float32)
    y_in = jax.random.normal(k_y, (N, Cy, Hy, Wy), jnp.float32)

    params = {
        # nn.Conv2d(Cx, num_filters, kernel_size=(3,3)) -> weight (Cout,Cin,3,3), bias (Cout,)
        "conv_w": 0.1 * jax.random.normal(k_w, (num_filters, Cx, 3, 3), jnp.float32),
        "conv_b": 0.05 * jax.random.normal(k_b, (num_filters,), jnp.float32),
        # BatchNorm2d(num_features = num_filters*n_divs + Cy)
        "gamma": 1.0 + 0.1 * jax.random.normal(k_g, (Ctot,), jnp.float32),
        "beta": 0.05 * jax.random.normal(k_be, (Ctot,), jnp.float32),
    }

    out = decode_sub_block(x_in, y_in, params, scale_factor=2)
    out = jax.block_until_ready(out)

    assert out.shape == (N, Cy + num_filters, Hy, Wy), out.shape
    ref = _reference(x_in, y_in, params, scale_factor=2)
    np.testing.assert_allclose(np.asarray(out), np.asarray(ref), atol=2e-4, rtol=2e-4)

    print("KERNEL_OK")
</pallas_src>

<mosaic_0001>
module attributes {stable_mosaic.version = 11 : i64} {
  func.func @kernel(%arg0: i32, %arg1: memref<1x32x8xf32, #tpu.memory_space<vmem>>, %arg2: memref<1x4x256xf32, #tpu.memory_space<vmem>>, %arg3: memref<8x16xf32, #tpu.memory_space<vmem>>, %arg4: memref<9x8x4xf32, #tpu.memory_space<vmem>>, %arg5: memref<2x288xf32, #tpu.memory_space<vmem>>, %arg6: memref<1x12x2xf32, #tpu.memory_space<vmem>>) attributes {dimension_semantics = [#tpu.dimension_semantics<parallel>], iteration_bounds = array<i64: 2>, scalar_prefetch = 0 : i64, scratch_operands = 0 : i64, tpu.core_type = #tpu.core_type<tc>, window_params = [{transform_indices = @transform_0, window_bounds = array<i64: 1, 32, 8>}, {transform_indices = @transform_1, window_bounds = array<i64: 1, 4, 256>}, {pipeline_mode = #tpu.pipeline_mode<synchronous>, transform_indices = @transform_2, window_bounds = array<i64: 8, 16>}, {pipeline_mode = #tpu.pipeline_mode<synchronous>, transform_indices = @transform_3, window_bounds = array<i64: 9, 8, 4>}, {pipeline_mode = #tpu.pipeline_mode<synchronous>, transform_indices = @transform_4, window_bounds = array<i64: 2, 288>}, {transform_indices = @transform_5, window_bounds = array<i64: 1, 12, 2>}]} {
    %c0 = arith.constant 0 : index
    %c0_0 = arith.constant 0 : index
    %c0_1 = arith.constant 0 : index
    %0 = vector.load %arg1[%c0, %c0_0, %c0_1] : memref<1x32x8xf32, #tpu.memory_space<vmem>>, vector<1x32x8xf32>
    %1 = vector.shape_cast %0 : vector<1x32x8xf32> to vector<32x8xf32>
    %c0_2 = arith.constant 0 : index
    %c0_3 = arith.constant 0 : index
    %2 = vector.load %arg3[%c0_2, %c0_3] : memref<8x16xf32, #tpu.memory_space<vmem>>, vector<8x16xf32>
    %c0_4 = arith.constant 0 : index
    %c0_5 = arith.constant 0 : index
    %3 = vector.load %arg5[%c0_4, %c0_5] : memref<2x288xf32, #tpu.memory_space<vmem>>, vector<2x288xf32>
    %cst = arith.constant dense<0.000000e+00> : vector<32x16xf32>
    %4 = tpu.matmul %1, %2, %cst {dimension_numbers = #tpu.dot_dimension_numbers<[1], [0], [0], [1], [0, 0, 1, 1], [], []>} : vector<32x8xf32>, vector<8x16xf32>, vector<32x16xf32> -> vector<32x16xf32>
    %cst_6 = arith.constant 0.000000e+00 : f32
    %5 = vector.broadcast %cst_6 : f32 to vector<4x16xf32>
    %6 = vector.extract_strided_slice %4 {offsets = [0, 0], sizes = [4, 16], strides = [1, 1]} : vector<32x16xf32> to vector<4x16xf32>
    %7 = vector.extract_strided_slice %4 {offsets = [4, 0], sizes = [4, 16], strides = [1, 1]} : vector<32x16xf32> to vector<4x16xf32>
    %8 = vector.extract_strided_slice %4 {offsets = [8, 0], sizes = [4, 16], strides = [1, 1]} : vector<32x16xf32> to vector<4x16xf32>
    %9 = vector.extract_strided_slice %4 {offsets = [12, 0], sizes = [4, 16], strides = [1, 1]} : vector<32x16xf32> to vector<4x16xf32>
    %10 = vector.extract_strided_slice %4 {offsets = [16, 0], sizes = [4, 16], strides = [1, 1]} : vector<32x16xf32> to vector<4x16xf32>
    %11 = vector.extract_strided_slice %4 {offsets = [20, 0], sizes = [4, 16], strides = [1, 1]} : vector<32x16xf32> to vector<4x16xf32>
    %12 = vector.extract_strided_slice %4 {offsets = [24, 0], sizes = [4, 16], strides = [1, 1]} : vector<32x16xf32> to vector<4x16xf32>
    %13 = vector.extract_strided_slice %4 {offsets = [28, 0], sizes = [4, 16], strides = [1, 1]} : vector<32x16xf32> to vector<4x16xf32>
    %cst_7 = arith.constant 0.000000e+00 : f32
    %14 = vector.broadcast %cst_7 : f32 to vector<4x16xf32>
    %15 = tpu.concatenate %5, %6, %6, %7, %7, %8, %8, %9, %9, %10, %10, %11, %11, %12, %12, %13 in 1 : vector<4x16xf32>, vector<4x16xf32>, vector<4x16xf32>, vector<4x16xf32>, vector<4x16xf32>, vector<4x16xf32>, vector<4x16xf32>, vector<4x16xf32>, vector<4x16xf32>, vector<4x16xf32>, vector<4x16xf32>, vector<4x16xf32>, vector<4x16xf32>, vector<4x16xf32>, vector<4x16xf32>, vector<4x16xf32> -> vector<4x256xf32>
    %16 = tpu.concatenate %13, %14 in 1 : vector<4x16xf32>, vector<4x16xf32> -> vector<4x32xf32>
    %17 = tpu.concatenate %15, %16 in 1 : vector<4x256xf32>, vector<4x32xf32> -> vector<4x288xf32>
    %c1_i32 = arith.constant 1 : i32
    %18 = tpu.dynamic_rotate %17 by %c1_i32 dim 1 : vector<4x288xf32>, i32 -> vector<4x288xf32>
    %19 = vector.extract_strided_slice %3 {offsets = [0, 0], sizes = [1, 288], strides = [1, 1]} : vector<2x288xf32> to vector<1x288xf32>
    %20 = vector.broadcast %19 : vector<1x288xf32> to vector<4x288xf32>
    %21 = arith.mulf %18, %20 : vector<4x288xf32>
    %c0_8 = arith.constant 0 : index
    %c0_9 = arith.constant 0 : index
    %c0_10 = arith.constant 0 : index
    %22 = vector.load %arg4[%c0_8, %c0_9, %c0_10] : memref<9x8x4xf32, #tpu.memory_space<vmem>>, vector<1x8x4xf32>
    %23 = vector.shape_cast %22 : vector<1x8x4xf32> to vector<8x4xf32>
    %cst_11 = arith.constant dense<0.000000e+00> : vector<8x288xf32>
    %24 = tpu.matmul %23, %21, %cst_11 {dimension_numbers = #tpu.dot_dimension_numbers<[1], [0], [0], [1], [0, 0, 1, 1], [], []>} : vector<8x4xf32>, vector<4x288xf32>, vector<8x288xf32> -> vector<8x288xf32>
    %c1 = arith.constant 1 : index
    %c0_12 = arith.constant 0 : index
    %c0_13 = arith.constant 0 : index
    %25 = vector.load %arg4[%c1, %c0_12, %c0_13] : memref<9x8x4xf32, #tpu.memory_space<vmem>>, vector<1x8x4xf32>
    %26 = vector.shape_cast %25 : vector<1x8x4xf32> to vector<8x4xf32>
    %cst_14 = arith.constant dense<0.000000e+00> : vector<8x288xf32>
    %27 = tpu.matmul %26, %17, %cst_14 {dimension_numbers = #tpu.dot_dimension_numbers<[1], [0], [0], [1], [0, 0, 1, 1], [], []>} : vector<8x4xf32>, vector<4x288xf32>, vector<8x288xf32> -> vector<8x288xf32>
    %28 = arith.addf %24, %27 : vector<8x288xf32>
    %c287_i32 = arith.constant 287 : i32
    %29 = tpu.dynamic_rotate %17 by %c287_i32 dim 1 : vector<4x288xf32>, i32 -> vector<4x288xf32>
    %30 = vector.extract_strided_slice %3 {offsets = [1, 0], sizes = [1, 288], strides = [1, 1]} : vector<2x288xf32> to vector<1x288xf32>
    %31 = vector.broadcast %30 : vector<1x288xf32> to vector<4x288xf32>
    %32 = arith.mulf %29, %31 : vector<4x288xf32>
    %c2 = arith.constant 2 : index
    %c0_15 = arith.constant 0 : index
    %c0_16 = arith.constant 0 : index
    %33 = vector.load %arg4[%c2, %c0_15, %c0_16] : memref<9x8x4xf32, #tpu.memory_space<vmem>>, vector<1x8x4xf32>
    %34 = vector.shape_cast %33 : vector<1x8x4xf32> to vector<8x4xf32>
    %cst_17 = arith.constant dense<0.000000e+00> : vector<8x288xf32>
    %35 = tpu.matmul %34, %32, %cst_17 {dimension_numbers = #tpu.dot_dimension_numbers<[1], [0], [0], [1], [0, 0, 1, 1], [], []>} : vector<8x4xf32>, vector<4x288xf32>, vector<8x288xf32> -> vector<8x288xf32>
    %36 = arith.addf %28, %35 : vector<8x288xf32>
    %c273_i32 = arith.constant 273 : i32
    %37 = tpu.dynamic_rotate %17 by %c273_i32 dim 1 : vector<4x288xf32>, i32 -> vector<4x288xf32>
    %38 = vector.extract_strided_slice %3 {offsets = [0, 0], sizes = [1, 288], strides = [1, 1]} : vector<2x288xf32> to vector<1x288xf32>
    %39 = vector.broadcast %38 : vector<1x288xf32> to vector<4x288xf32>
    %40 = arith.mulf %37, %39 : vector<4x288xf32>
    %c3 = arith.constant 3 : index
    %c0_18 = arith.constant 0 : index
    %c0_19 = arith.constant 0 : index
    %41 = vector.load %arg4[%c3, %c0_18, %c0_19] : memref<9x8x4xf32, #tpu.memory_space<vmem>>, vector<1x8x4xf32>
    %42 = vector.shape_cast %41 : vector<1x8x4xf32> to vector<8x4xf32>
    %cst_20 = arith.constant dense<0.000000e+00> : vector<8x288xf32>
    %43 = tpu.matmul %42, %40, %cst_20 {dimension_numbers = #tpu.dot_dimension_numbers<[1], [0], [0], [1], [0, 0, 1, 1], [], []>} : vector<8x4xf32>, vector<4x288xf32>, vector<8x288xf32> -> vector<8x288xf32>
    %44 = arith.addf %36, %43 : vector<8x288xf32>
    %c272_i32 = arith.constant 272 : i32
    %45 = tpu.dynamic_rotate %17 by %c272_i32 dim 1 : vector<4x288xf32>, i32 -> vector<4x288xf32>
    %c4 = arith.constant 4 : index
    %c0_21 = arith.constant 0 : index
    %c0_22 = arith.constant 0 : index
    %46 = vector.load %arg4[%c4, %c0_21, %c0_22] : memref<9x8x4xf32, #tpu.memory_space<vmem>>, vector<1x8x4xf32>
    %47 = vector.shape_cast %46 : vector<1x8x4xf32> to vector<8x4xf32>
    %cst_23 = arith.constant dense<0.000000e+00> : vector<8x288xf32>
    %48 = tpu.matmul %47, %45, %cst_23 {dimension_numbers = #tpu.dot_dimension_numbers<[1], [0], [0], [1], [0, 0, 1, 1], [], []>} : vector<8x4xf32>, vector<4x288xf32>, vector<8x288xf32> -> vector<8x288xf32>
    %49 = arith.addf %44, %48 : vector<8x288xf32>
    %c271_i32 = arith.constant 271 : i32
    %50 = tpu.dynamic_rotate %17 by %c271_i32 dim 1 : vector<4x288xf32>, i32 -> vector<4x288xf32>
    %51 = vector.extract_strided_slice %3 {offsets = [1, 0], sizes = [1, 288], strides = [1, 1]} : vector<2x288xf32> to vector<1x288xf32>
    %52 = vector.broadcast %51 : vector<1x288xf32> to vector<4x288xf32>
    %53 = arith.mulf %50, %52 : vector<4x288xf32>
    %c5 = arith.constant 5 : index
    %c0_24 = arith.constant 0 : index
    %c0_25 = arith.constant 0 : index
    %54 = vector.load %arg4[%c5, %c0_24, %c0_25] : memref<9x8x4xf32, #tpu.memory_space<vmem>>, vector<1x8x4xf32>
    %55 = vector.shape_cast %54 : vector<1x8x4xf32> to vector<8x4xf32>
    %cst_26 = arith.constant dense<0.000000e+00> : vector<8x288xf32>
    %56 = tpu.matmul %55, %53, %cst_26 {dimension_numbers = #tpu.dot_dimension_numbers<[1], [0], [0], [1], [0, 0, 1, 1], [], []>} : vector<8x4xf32>, vector<4x288xf32>, vector<8x288xf32> -> vector<8x288xf32>
    %57 = arith.addf %49, %56 : vector<8x288xf32>
    %c257_i32 = arith.constant 257 : i32
    %58 = tpu.dynamic_rotate %17 by %c257_i32 dim 1 : vector<4x288xf32>, i32 -> vector<4x288xf32>
    %59 = vector.extract_strided_slice %3 {offsets = [0, 0], sizes = [1, 288], strides = [1, 1]} : vector<2x288xf32> to vector<1x288xf32>
    %60 = vector.broadcast %59 : vector<1x288xf32> to vector<4x288xf32>
    %61 = arith.mulf %58, %60 : vector<4x288xf32>
    %c6 = arith.constant 6 : index
    %c0_27 = arith.constant 0 : index
    %c0_28 = arith.constant 0 : index
    %62 = vector.load %arg4[%c6, %c0_27, %c0_28] : memref<9x8x4xf32, #tpu.memory_space<vmem>>, vector<1x8x4xf32>
    %63 = vector.shape_cast %62 : vector<1x8x4xf32> to vector<8x4xf32>
    %cst_29 = arith.constant dense<0.000000e+00> : vector<8x288xf32>
    %64 = tpu.matmul %63, %61, %cst_29 {dimension_numbers = #tpu.dot_dimension_numbers<[1], [0], [0], [1], [0, 0, 1, 1], [], []>} : vector<8x4xf32>, vector<4x288xf32>, vector<8x288xf32> -> vector<8x288xf32>
    %65 = arith.addf %57, %64 : vector<8x288xf32>
    %c256_i32 = arith.constant 256 : i32
    %66 = tpu.dynamic_rotate %17 by %c256_i32 dim 1 : vector<4x288xf32>, i32 -> vector<4x288xf32>
    %c7 = arith.constant 7 : index
    %c0_30 = arith.constant 0 : index
    %c0_31 = arith.constant 0 : index
    %67 = vector.load %arg4[%c7, %c0_30, %c0_31] : memref<9x8x4xf32, #tpu.memory_space<vmem>>, vector<1x8x4xf32>
    %68 = vector.shape_cast %67 : vector<1x8x4xf32> to vector<8x4xf32>
    %cst_32 = arith.constant dense<0.000000e+00> : vector<8x288xf32>
    %69 = tpu.matmul %68, %66, %cst_32 {dimension_numbers = #tpu.dot_dimension_numbers<[1], [0], [0], [1], [0, 0, 1, 1], [], []>} : vector<8x4xf32>, vector<4x288xf32>, vector<8x288xf32> -> vector<8x288xf32>
    %70 = arith.addf %65, %69 : vector<8x288xf32>
    %c255_i32 = arith.constant 255 : i32
    %71 = tpu.dynamic_rotate %17 by %c255_i32 dim 1 : vector<4x288xf32>, i32 -> vector<4x288xf32>
    %72 = vector.extract_strided_slice %3 {offsets = [1, 0], sizes = [1, 288], strides = [1, 1]} : vector<2x288xf32> to vector<1x288xf32>
    %73 = vector.broadcast %72 : vector<1x288xf32> to vector<4x288xf32>
    %74 = arith.mulf %71, %73 : vector<4x288xf32>
    %c8 = arith.constant 8 : index
    %c0_33 = arith.constant 0 : index
    %c0_34 = arith.constant 0 : index
    %75 = vector.load %arg4[%c8, %c0_33, %c0_34] : memref<9x8x4xf32, #tpu.memory_space<vmem>>, vector<1x8x4xf32>
    %76 = vector.shape_cast %75 : vector<1x8x4xf32> to vector<8x4xf32>
    %cst_35 = arith.constant dense<0.000000e+00> : vector<8x288xf32>
    %77 = tpu.matmul %76, %74, %cst_35 {dimension_numbers = #tpu.dot_dimension_numbers<[1], [0], [0], [1], [0, 0, 1, 1], [], []>} : vector<8x4xf32>, vector<4x288xf32>, vector<8x288xf32> -> vector<8x288xf32>
    %78 = arith.addf %70, %77 : vector<8x288xf32>
    %79 = vector.extract_strided_slice %78 {offsets = [0, 0], sizes = [8, 256], strides = [1, 1]} : vector<8x288xf32> to vector<8x256xf32>
    %c0_36 = arith.constant 0 : index
    %c0_37 = arith.constant 0 : index
    %c0_38 = arith.constant 0 : index
    %80 = vector.load %arg2[%c0_36, %c0_37, %c0_38] : memref<1x4x256xf32, #tpu.memory_space<vmem>>, vector<1x4x256xf32>
    %81 = vector.shape_cast %80 : vector<1x4x256xf32> to vector<4x256xf32>
    %cst_39 = arith.constant dense<0.000000e+00> : vector<8xf32>
    %82 = vector.multi_reduction <add>, %79, %cst_39 [1] : vector<8x256xf32> to vector<8xf32>
    %83 = vector.shape_cast %82 : vector<8xf32> to vector<8x1xf32>
    %cst_40 = arith.constant 3.906250e-03 : f32
    %84 = vector.broadcast %cst_40 : f32 to vector<8x1xf32>
    %85 = arith.mulf %83, %84 : vector<8x1xf32>
    %86 = vector.broadcast %85 : vector<8x1xf32> to vector<8x256xf32>
    %87 = arith.subf %79, %86 : vector<8x256xf32>
    %88 = arith.mulf %87, %87 : vector<8x256xf32>
    %cst_41 = arith.constant dense<0.000000e+00> : vector<8xf32>
    %89 = vector.multi_reduction <add>, %88, %cst_41 [1] : vector<8x256xf32> to vector<8xf32>
    %90 = vector.shape_cast %89 : vector<8xf32> to vector<8x1xf32>
    %cst_42 = arith.constant dense<0.000000e+00> : vector<4xf32>
    %91 = vector.multi_reduction <add>, %81, %cst_42 [1] : vector<4x256xf32> to vector<4xf32>
    %92 = vector.shape_cast %91 : vector<4xf32> to vector<4x1xf32>
    %cst_43 = arith.constant 3.906250e-03 : f32
    %93 = vector.broadcast %cst_43 : f32 to vector<4x1xf32>
    %94 = arith.mulf %92, %93 : vector<4x1xf32>
    %95 = vector.broadcast %94 : vector<4x1xf32> to vector<4x256xf32>
    %96 = arith.subf %81, %95 : vector<4x256xf32>
    %97 = arith.mulf %96, %96 : vector<4x256xf32>
    %cst_44 = arith.constant dense<0.000000e+00> : vector<4xf32>
    %98 = vector.multi_reduction <add>, %97, %cst_44 [1] : vector<4x256xf32> to vector<4xf32>
    %99 = vector.shape_cast %98 : vector<4xf32> to vector<4x1xf32>
    %c0_45 = arith.constant 0 : index
    %c0_46 = arith.constant 0 : index
    %c0_47 = arith.constant 0 : index
    %100 = vector.load %arg6[%c0_45, %c0_46, %c0_47] : memref<1x12x2xf32, #tpu.memory_space<vmem>>, vector<1x8x1xf32>
    %101 = vector.shape_cast %100 : vector<1x8x1xf32> to vector<8x1xf32>
    %102 = vector.shape_cast %83 : vector<8x1xf32> to vector<1x8x1xf32>
    tpu.vector_store %arg6[%c0_45, %c0_46, %c0_47], %102 {strides = array<i32>} : memref<1x12x2xf32, #tpu.memory_space<vmem>>, vector<1x8x1xf32>,
    %c0_48 = arith.constant 0 : index
    %c0_49 = arith.constant 0 : index
    %c1_50 = arith.constant 1 : index
    %103 = vector.load %arg6[%c0_48, %c0_49, %c1_50] : memref<1x12x2xf32, #tpu.memory_space<vmem>>, vector<1x8x1xf32>
    %104 = vector.shape_cast %103 : vector<1x8x1xf32> to vector<8x1xf32>
    %105 = vector.shape_cast %90 : vector<8x1xf32> to vector<1x8x1xf32>
    tpu.vector_store %arg6[%c0_48, %c0_49, %c1_50], %105 {strides = array<i32>} : memref<1x12x2xf32, #tpu.memory_space<vmem>>, vector<1x8x1xf32>,
    %c0_51 = arith.constant 0 : index
    %c8_52 = arith.constant 8 : index
    %c0_53 = arith.constant 0 : index
    %106 = vector.load %arg6[%c0_51, %c8_52, %c0_53] : memref<1x12x2xf32, #tpu.memory_space<vmem>>, vector<1x4x1xf32>
    %107 = vector.shape_cast %106 : vector<1x4x1xf32> to vector<4x1xf32>
    %108 = vector.shape_cast %92 : vector<4x1xf32> to vector<1x4x1xf32>
    tpu.vector_store %arg6[%c0_51, %c8_52, %c0_53], %108 {strides = array<i32>} : memref<1x12x2xf32, #tpu.memory_space<vmem>>, vector<1x4x1xf32>,
    %c0_54 = arith.constant 0 : index
    %c8_55 = arith.constant 8 : index
    %c1_56 = arith.constant 1 : index
    %109 = vector.load %arg6[%c0_54, %c8_55, %c1_56] : memref<1x12x2xf32, #tpu.memory_space<vmem>>, vector<1x4x1xf32>
    %110 = vector.shape_cast %109 : vector<1x4x1xf32> to vector<4x1xf32>
    %111 = vector.shape_cast %99 : vector<4x1xf32> to vector<1x4x1xf32>
    tpu.vector_store %arg6[%c0_54, %c8_55, %c1_56], %111 {strides = array<i32>} : memref<1x12x2xf32, #tpu.memory_space<vmem>>, vector<1x4x1xf32>,
    return
  }
  func.func @transform_0(%arg0: i32) -> (i32, i32, i32) {
    %c0_i32 = arith.constant 0 : i32
    %c0_i32_0 = arith.constant 0 : i32
    %c0_i32_1 = arith.constant 0 : i32
    return %arg0, %c0_i32, %c0_i32_0 : i32, i32, i32
  }
  func.func @transform_1(%arg0: i32) -> (i32, i32, i32) {
    %c0_i32 = arith.constant 0 : i32
    %c0_i32_0 = arith.constant 0 : i32
    %c0_i32_1 = arith.constant 0 : i32
    return %arg0, %c0_i32, %c0_i32_0 : i32, i32, i32
  }
  func.func @transform_2(%arg0: i32) -> (i32, i32) {
    %c0_i32 = arith.constant 0 : i32
    %c0_i32_0 = arith.constant 0 : i32
    %c0_i32_1 = arith.constant 0 : i32
    return %c0_i32, %c0_i32_0 : i32, i32
  }
  func.func @transform_3(%arg0: i32) -> (i32, i32, i32) {
    %c0_i32 = arith.constant 0 : i32
    %c0_i32_0 = arith.constant 0 : i32
    %c0_i32_1 = arith.constant 0 : i32
    %c0_i32_2 = arith.constant 0 : i32
    return %c0_i32, %c0_i32_0, %c0_i32_1 : i32, i32, i32
  }
  func.func @transform_4(%arg0: i32) -> (i32, i32) {
    %c0_i32 = arith.constant 0 : i32
    %c0_i32_0 = arith.constant 0 : i32
    %c0_i32_1 = arith.constant 0 : i32
    return %c0_i32, %c0_i32_0 : i32, i32
  }
  func.func @transform_5(%arg0: i32) -> (i32, i32, i32) {
    %c0_i32 = arith.constant 0 : i32
    %c0_i32_0 = arith.constant 0 : i32
    %c0_i32_1 = arith.constant 0 : i32
    return %arg0, %c0_i32, %c0_i32_0 : i32, i32, i32
  }
}

</mosaic_0001>

<bundles_post_ra>
// kernel: tpu_custom_call.1
= control target key start
LH: loop header
LB: loop body
LE: loop exit
PB: predicated region body
PF: predicated region fallthrough
CT: control target
= control target key end

     0   :  { %s1291_s18 = smov 0   ;;  %s1530_s0 = inlined_call_operand.vmem [shape: f32[2,32,8], index: 0, kind: input, shape index: {}]   ;;  %s1531_s1 = inlined_call_operand.vmem [shape: f32[2,4,256], index: 1, kind: input, shape index: {}]   ;;  %s1532_s2 = inlined_call_operand.vmem [shape: f32[8,16], index: 2, kind: input, shape index: {}]   ;;  %s1533_s3 = inlined_call_operand.vmem [shape: f32[9,8,4], index: 3, kind: input, shape index: {}]   ;;  %s1534_s4 = inlined_call_operand.vmem [shape: f32[2,288], index: 4, kind: input, shape index: {}]   ;;  %s1535_s5 = inlined_call_operand.vmem [shape: f32[2,12,2], index: 5, kind: output, shape index: {}]  }
   0x1 LB: > { %s1145_s19 = sadd.s32 4294967295, %s1241_s18   ;;  %p1149_p0 = scmp.ge.s32.totalorder %s1241_s18, 1  ;;  %s1241_s18 = sphi %s1291_s18, %s15_s18  }
   0x2   : > { %p197_p1 = scmp.lt.s32.totalorder %s1241_s18, 3 }
   0x4   : > { %p198_p2 = pnand %p1149_p0, %p197_p1 }
   0x5   : > { %p230_p3 = scmp.lt.s32.totalorder (!%p198_p2), %s1145_s19, 1  ;;  %s1243_s30 = smov (!%p198_p2), 16  }
   0x6   : > { %201 = sbr.rel (%p198_p2) target bundleno = 1004 (0x3ec), region = 40  ;;  %s1244_s6 = smov (!%p198_p2), 48  }
   0x7   : > { %s1245_s7 = smov (!%p198_p2), 32   ;;  %s1246_s8 = smov (!%p198_p2), 80  }
   0x8   : > { %s1247_s9 = smov (!%p198_p2), 64   ;;  %s1248_s10 = smov (!%p198_p2), 96  }
   0x9   : > { %s1249_s11 = smov (!%p198_p2), 112   ;;  %s1250_s14 = smov (!%p198_p2), 31  }
   0xa   : > { %s1251_s15 = smov (!%p198_p2), 1   ;;  %s1252_s16 = smov (!%p198_p2), 15  }
   0xb   : > { %v249_v0 = vld [vmem:[%s1532_s2] sm:$0xff]  ;;  %s1537_s19 = smov (!%p230_p3, %s1145_s19), 1  ;;  %vm251_vm0 = vcmask 64512   ;;  %s1253_s17 = smov 17   ;;  %vm346_vm1 = vcmask 261120   ;;  %vm344_vm2 = vcmask 130048  }
   0xc   : > { %279 = vmatpush.msra.mxu0 %v249_v0  ;;  %s1206_s22 = sshll.u32 %s1537_s19, 5  ;;  %s1207_s23 = sshll.u32 %s1537_s19, 3  ;;  %v250_v14 = vld [vmem:[%s1534_s4] sm:$0x3f]  ;;  %vm348_vm3 = vcmask 392192   ;;  %vm350_vm4 = vcmask 523264  }
   0xd   : > { %s234_s26 = scalar_lea.vmem %s1530_s0, %s1206_s22  ;;  %s239_s29 = scalar_lea.vmem %s1531_s1, %s1207_s23  ;;  %v380_v15 = vperm.slane %v250_v14, 0  ;;  %v382_v17 = vperm.slane %v250_v14, 4  ;;  %v521_v19 = vperm.slane %v250_v14, 3  ;;  %v522_v20 = vperm.slane %v250_v14, 5 }
   0xe   : > { %v245_v1 = vld [vmem:[%s234_s26] sm:$0xff]  ;;  %v246_v3 = vld [vmem:[%s234_s26 + $0x8] sm:$0xff]  ;;  %v247_v4 = vld [vmem:[%s234_s26 + $0x10] sm:$0xff]  ;;  %v381_v23 = vperm.slane %v250_v14, 2  ;;  %s1254_s20 = smov 33   ;;  %vm352_vm5 = vcmask 654336  }
   0xf   : > { %v1312_v2 = vld [vmem:[%s239_s29] sm:$0xff]  ;;  %1156 = vmatmul.msk.f32.vlgmr.msra.gmra.mxu0 %vm251_vm0, %v245_v1  ;;  %v248_v5 = vld [vmem:[%s234_s26 + $0x18] sm:$0xff]  ;;  %v1336_v16 = vperm.slane %v380_v15, 0  ;;  %v388_v18 = vperm.slane %v382_v17, 0  ;;  %v1341_v21 = vperm.slane %v521_v19, 1  ;;  %v528_v22 = vperm.slane %v522_v20, 1 }
  0x10   : > { %1041 = vst [vmem:[#allocation1] ss:$2 sm:$0xff] %v1312_v2  ;;  %v387_v24 = vperm.slane %v381_v23, 0  ;;  %vm354_vm6 = vcmask 785408   ;;  %vm356_vm7 = vcmask 916480   ;;  %vm414_vm8 = vcmask 1043456  }
  0x11   : > { %v520_v46 = vperm.slane %v250_v14, 1  ;;  %vm538_vm9 = vcmask 7168   ;;  %vm369_vm10 = vcmask 1047808   ;;  %vm616_vm11 = vcmask 121856   ;;  %s1255_s21 = smov 127   ;;  %s1256_s22 = smov 113  }
  0x12   : > { %vm398_vm12 = vcmask 252928   ;;  %s1257_s23 = smov 97   ;;  %s1258_s24 = smov 111   ;;  %vm410_vm13 = vcmask 31744   ;;  %vm754_vm14 = vcmask 138240   ;;  %vm558_vm15 = vcmask 1039360  }
  0x13   : > { %v526_v49 = vperm.slane %v520_v46, 1  ;;  %s1259_s25 = smov 95  }
  0x17   : > { %1157 = vmatmul.msk.f32.gmra.mxu0 %vm251_vm0, %v246_v3 }
  0x1f   : > { %1158 = vmatmul.msk.f32.gmra.mxu0 %vm251_vm0, %v247_v4 }
  0x27   : > { %1159 = vmatmul.msk.f32.gmra.mxu0 %vm251_vm0, %v248_v5  ;;  %vm956_vm0 = vcmask 269312  }
  0x8c   : > { %v281_v6 = vpop.f32.mrf.mxu0 }
  0x8d   : > { %294 = vrot.lane.b32.xlu0 %v281_v6, %s1243_s30  ;;  %v300_v7 = vrot.slane %v281_v6, 4 }
  0x8f   : > { %301 = vrot.lane.b32.xlu1 %v300_v7, %s1244_s6 }
  0x94   : > { %v1315_v8 = vpop.f32.mrf.mxu0 }
  0x95   : > { %297 = vrot.lane.b32.xlu0 %v281_v6, %s1245_s7  ;;  %308 = vrot.lane.b32.xlu2 %v1315_v8, %s1246_s8  ;;  %v314_v9 = vrot.slane %v1315_v8, 4 }
  0x97   : > { %304 = vrot.lane.b32.xlu1 %v300_v7, %s1247_s9 }
  0x9c   : > { %v287_v10 = vpop.f32.mrf.mxu0 }
  0x9d   : > { %311 = vrot.lane.b32.xlu2 %v1315_v8, %s1248_s10  ;;  %315 = vrot.lane.b32.xlu0 %v314_v9, %s1249_s11  ;;  %v326_v11 = vrot.slane %v287_v10, 4 }
  0x9f   : > { %320 = vrot.lane.b32.xlu1 %v287_v10, %s1243_s30 }
  0xa4   : > { %v1326_v12 = vpop.f32.mrf.mxu0 }
  0xa5   : > { %327 = vrot.lane.b32.xlu0 %v326_v11, %s1244_s6  ;;  %323 = vrot.lane.b32.xlu2 %v287_v10, %s1245_s7  ;;  %v340_v13 = vrot.slane %v1326_v12, 4  ;;  %v365_v59 = vsel %vm344_vm2, %v1326_v12, 0.0 }
  0xa6   : > { %v367_v60 = vrot.slane %v365_v59, 4 }
  0xa7   : > { %330 = vrot.lane.b32.xlu1 %v326_v11, %s1247_s9 }
  0xad   : > { %337 = vrot.lane.b32.xlu0 %v1326_v12, %s1248_s10  ;;  %334 = vrot.lane.b32.xlu2 %v1326_v12, %s1246_s8 }
  0xaf   : > { %341 = vrot.lane.b32.xlu1 %v340_v13, %s1249_s11 }
  0xb5   : > { %534 = vrot.lane.b32.xlu0 %v1341_v21, %s1251_s15 }
  0xb7   : > { %392 = vrot.lane.b32.xlu1 %v1336_v16, %s1250_s14 }
  0xbd   : > { %612 = vrot.lane.b32.xlu0 %v387_v24, %s1252_s16 }
  0xbf   : > { %396 = vrot.lane.b32.xlu1 %v388_v18, %s1250_s14 }
  0xc7   : > { %536 = vrot.lane.b32.xlu1 %v528_v22, %s1251_s15 }
  0xcf   : > { %614 = vrot.lane.b32.xlu1 %v388_v18, %s1252_s16 }
  0xd7   : > { %752 = vrot.lane.b32.xlu1 %v528_v22, %s1253_s17 }
  0xdf   : > { %954 = vrot.lane.b32.xlu1 %v528_v22, %s1254_s20 }
  0xef   : > { %v309_v26 = vpop.permute.xlu2 %308 }
  0xf7   : > { %v312_v33 = vpop.permute.xlu2 %311 }
  0xff   : > { %v295_v25 = vpop.permute.xlu0 %294  ;;  %v324_v40 = vpop.permute.xlu2 %323 }
 0x100   : > { %v345_v28 = vsel %vm344_vm2, 0.0, %v295_v25 }
 0x101   : > { %v302_v27 = vpop.permute.xlu1 %301 }
 0x107   : > { %v298_v29 = vpop.permute.xlu0 %297  ;;  %v335_v48 = vpop.permute.xlu2 %334 }
 0x108   : > { %v347_v30 = vsel %vm346_vm1, %v345_v28, %v298_v29  ;;  %v1160_v28 = vld [vmem:[%s1533_s3 + $0x8] sm:$0xff] }
 0x109   : > { %v349_v31 = vsel %vm348_vm3, %v347_v30, %v302_v27  ;;  %v305_v32 = vpop.permute.xlu1 %304 }
 0x10a   : > { %v351_v34 = vsel %vm350_vm4, %v349_v31, %v305_v32 }
 0x10b   : > { %v353_v35 = vsel %vm352_vm5, %v351_v34, %v309_v26 }
 0x10c   : > { %v355_v36 = vsel %vm354_vm6, %v353_v35, %v312_v33 }
 0x10f   : > { %v316_v37 = vpop.permute.xlu0 %315 }
 0x110   : > { %v1357_v38 = vsel %vm356_vm7, %v355_v36, %v316_v37 }
 0x111   : > { %1161 = vmatpush.msk.msra.mxu1 %vm414_vm8, %v1357_v38  ;;  %v321_v39 = vpop.permute.xlu1 %320  ;;  %370 = vrot.lane.b32.xlu2 %v1357_v38, %s1245_s7 }
 0x112   : > { %v358_v41 = vsel %vm344_vm2, %v314_v9, %v321_v39  ;;  %1162 = vmatmul.msk.f32.vlgmr.msra.gmra.mxu1 %vm410_vm13, %v1160_v28  ;;  %vm470_vm2 = vcmask 793600  }
 0x113   : > { %v359_v43 = vsel %vm346_vm1, %v358_v41, %v324_v40  ;;  %vm636_vm1 = vcmask 924672  }
 0x117   : > { %v328_v42 = vpop.permute.xlu0 %327 }
 0x118   : > { %v360_v44 = vsel %vm348_vm3, %v359_v43, %v328_v42  ;;  %vm774_vm3 = vcmask 908288  }
 0x119   : > { %v331_v45 = vpop.permute.xlu1 %330  ;;  %394 = vrot.lane.b32.xlu2 %v387_v24, %s1250_s14 }
 0x11a   : > { %v361_v47 = vsel %vm350_vm4, %v360_v44, %v331_v45  ;;  %vm976_vm4 = vcmask 777216  }
 0x11b   : > { %v362_v50 = vsel %vm352_vm5, %v361_v47, %v335_v48  ;;  %vm1074_vm5 = vcmask 3072  }
 0x11f   : > { %v338_v51 = vpop.permute.xlu0 %337 }
 0x120   : > { %v363_v52 = vsel %vm354_vm6, %v362_v50, %v338_v51 }
 0x121   : > { %532 = vrot.lane.b32.xlu2 %v526_v49, %s1251_s15  ;;  %v342_v53 = vpop.permute.xlu1 %341 }
 0x122   : > { %v1374_v54 = vsel %vm356_vm7, %v363_v52, %v342_v53 }
 0x123   : > { %373 = vrot.lane.b32.xlu0 %v1374_v54, %s1245_s7  ;;  %1163 = vmatpush.msk.msra.mxu2 %vm414_vm8, %v1374_v54 }
 0x124   : > { %1164 = vmatmul.msk.f32.vlgmr.msra.gmra.mxu2 %vm410_vm13, %v1160_v28 }
 0x127   : > { %v535_v57 = vpop.permute.xlu0 %534 }
 0x129   : > { %610 = vrot.lane.b32.xlu2 %v1336_v16, %s1252_s16  ;;  %v393_v55 = vpop.permute.xlu1 %392 }
 0x12a   : > { %v826_v23 = vmul.f32 %v393_v55, %v1357_v38 }
 0x12f   : > { %v613_v1 = vpop.permute.xlu0 %612 }
 0x131   : > { %748 = vrot.lane.b32.xlu2 %v526_v49, %s1253_s17  ;;  %v397_v56 = vpop.permute.xlu1 %396 }
 0x139   : > { %950 = vrot.lane.b32.xlu2 %v526_v49, %s1254_s20  ;;  %v537_v58 = vpop.permute.xlu1 %536 }
 0x13a   : > { %v540_v61 = vsel %vm538_vm9, %v535_v57, %v537_v58 }
 0x141   : > { %v615_v3 = vpop.permute.xlu1 %614 }
 0x142   : > { %v618_v4 = vsel %vm616_vm11, %v613_v1, %v615_v3 }
 0x149   : > { %v753_v29 = vpop.permute.xlu1 %752 }
 0x151   : > { %v955_v36 = vpop.permute.xlu1 %954 }
 0x16b   : > { %v371_v62 = vpop.permute.xlu2 %370 }
 0x16c   : > { %v1388_v63 = vsel %vm369_vm10, %v371_v62, %v367_v60 }
 0x16d   : > { %375 = vrot.lane.b32.xlu0 %v1388_v63, %s1245_s7  ;;  %v546_v0 = vmul.f32 %v540_v61, %v1388_v63  ;;  %v624_v7 = vmul.f32 %v618_v4, %v1388_v63  ;;  %v404_v16 = vmul.f32 %v393_v55, %v1388_v63  ;;  %v1169_v61 = vld [vmem:[%s1533_s3 + $0x10] sm:$0xff] }
 0x16f   : > { %556 = vrot.lane.b32.xlu1 %v546_v0, %s1255_s21 }
 0x173   : > { %v395_v5 = vpop.permute.xlu2 %394 }
 0x174   : > { %v400_v6 = vsel %vm398_vm12, %v395_v5, %v397_v56  ;;  %v399_v18 = vsel %vm398_vm12, %v393_v55, %v395_v5 }
 0x175   : > { %750 = vrot.lane.b32.xlu0 %v1341_v21, %s1253_s17  ;;  %v828_v39 = vmul.f32 %v400_v6, %v1388_v63 }
 0x177   : > { %634 = vrot.lane.b32.xlu1 %v624_v7, %s1256_s22 }
 0x17b   : > { %v533_v8 = vpop.permute.xlu2 %532 }
 0x17c   : > { %v544_v9 = vmul.f32 %v533_v8, %v1357_v38  ;;  %v539_v10 = vsel %vm538_vm9, %v533_v8, %v535_v57  ;;  %v407_v57 = vld [vmem:[%s1533_s3] sm:$0xff]  ;;  %v1184_v8 = vld [vmem:[%s1533_s3 + $0x28] sm:$0xff] }
 0x17d   : > { %952 = vrot.lane.b32.xlu0 %v1341_v21, %s1254_s20  ;;  %v545_v11 = vmul.f32 %v539_v10, %v1374_v54 }
 0x17e   : > { %552 = vrot.lane.b32.xlu2 %v544_v9, %s1255_s21 }
 0x17f   : > { %695 = vrot.lane.b32.xlu1 %v1388_v63, %s1249_s11 }
 0x183   : > { %v611_v12 = vpop.permute.xlu2 %610 }
 0x184   : > { %v622_v13 = vmul.f32 %v611_v12, %v1357_v38  ;;  %v617_v14 = vsel %vm616_vm11, %v611_v12, %v613_v1 }
 0x185   : > { %554 = vrot.lane.b32.xlu0 %v545_v11, %s1255_s21  ;;  %v623_v15 = vmul.f32 %v617_v14, %v1374_v54  ;;  %v1189_v14 = vld [vmem:[%s1533_s3 + $0x30] sm:$0xff]  ;;  %s1208_s21 = sshll.u32 %s1537_s19, 4 }
 0x186   : > { %630 = vrot.lane.b32.xlu2 %v622_v13, %s1256_s22 }
 0x18b   : > { %v749_v21 = vpop.permute.xlu2 %748 }
 0x18c   : > { %v760_v22 = vmul.f32 %v749_v21, %v1357_v38 }
 0x18d   : > { %632 = vrot.lane.b32.xlu0 %v623_v15, %s1256_s22 }
 0x18e   : > { %464 = vrot.lane.b32.xlu2 %v404_v16, %s1257_s23 }
 0x193   : > { %v951_v24 = vpop.permute.xlu2 %950 }
 0x194   : > { %v962_v25 = vmul.f32 %v951_v24, %v1357_v38 }
 0x195   : > { %v374_v17 = vpop.permute.xlu0 %373 }
 0x196   : > { %v377_v19 = vsel %vm369_vm10, %v374_v17, %v371_v62  ;;  %691 = vrot.lane.b32.xlu2 %v1357_v38, %s1249_s11  ;;  %v1174_v62 = vld [vmem:[%s1533_s3 + $0x18] sm:$0xff] }
 0x197   : > { %v405_v20 = vmul.f32 %v399_v18, %v377_v19 }
 0x199   : > { %466 = vrot.lane.b32.xlu0 %v405_v20, %s1257_s23  ;;  %v1194_v20 = vld [vmem:[%s1533_s3 + $0x38] sm:$0xff] }
 0x19e   : > { %768 = vrot.lane.b32.xlu2 %v760_v22, %s1258_s24 }
 0x1a1   : > { %693 = vrot.lane.b32.xlu0 %v1374_v54, %s1249_s11 }
 0x1a6   : > { %834 = vrot.lane.b32.xlu2 %v826_v23, %s1257_s23 }
 0x1ae   : > { %893 = vrot.lane.b32.xlu2 %v1357_v38, %s1248_s10  ;;  %v827_v38 = vmul.f32 %v399_v18, %v1374_v54 }
 0x1b6   : > { %970 = vrot.lane.b32.xlu2 %v962_v25, %s1259_s25 }
 0x1d8   : > { %v553_v40 = vpop.permute.xlu2 %552 }
 0x1df   : > { %v376_v26 = vpop.permute.xlu0 %375 }
 0x1e0   : > { %v378_v27 = vsel %vm369_vm10, %v376_v26, %v374_v17  ;;  %v631_v44 = vpop.permute.xlu2 %630  ;;  %v1199_v26 = vld [vmem:[%s1533_s3 + $0x40] sm:$0xff] }
 0x1e1   : > { %v406_v30 = vmul.f32 %v400_v6, %v378_v27  ;;  %v557_v41 = vpop.permute.xlu1 %556 }
 0x1e3   : > { %468 = vrot.lane.b32.xlu1 %v406_v30, %s1257_s23  ;;  %v1042_v30 = vld.sshfl [vmem:[#allocation1] sm:$0xff pattern:$0x75316420] }
 0x1e7   : > { %v751_v31 = vpop.permute.xlu0 %750 }
 0x1e8   : > { %v755_v32 = vsel %vm754_vm14, %v749_v21, %v751_v31  ;;  %v756_v33 = vsel %vm754_vm14, %v751_v31, %v753_v29  ;;  %v465_v53 = vpop.permute.xlu2 %464  ;;  %v438_v29 = vpop.f32.mrf.mxu1  ;;  %v1043_v31 = vld.sshfl [vmem:[#allocation1 + $0x8] sm:$0xff pattern:$0x75316420] }
 0x1e9   : > { %v761_v34 = vmul.f32 %v755_v32, %v1374_v54  ;;  %v762_v35 = vmul.f32 %v756_v33, %v1388_v63  ;;  %v635_v47 = vpop.permute.xlu1 %634  ;;  %v1046_v32 = vsel %vm414_vm8, %v1042_v30, 0.0  ;;  %v1047_v33 = vsel %vm414_vm8, %v1043_v31, 0.0 }
 0x1eb   : > { %770 = vrot.lane.b32.xlu0 %v761_v34, %s1258_s24  ;;  %772 = vrot.lane.b32.xlu1 %v762_v35, %s1258_s24  ;;  %v1048_v34 = vadd.f32 %v1047_v33, %v1046_v32  ;;  %s1517_s24 = scalar_lea.vmem %s1535_s5, %s1208_s21 }
 0x1ed   : > { %1049 = vadd.xlane.f32.xlu2 %v1048_v34 }
 0x1ef   : > { %v953_v37 = vpop.permute.xlu0 %952 }
 0x1f0   : > { %v957_v45 = vsel %vm956_vm0, %v951_v24, %v953_v37  ;;  %v958_v46 = vsel %vm956_vm0, %v953_v37, %v955_v36  ;;  %v692_v58 = vpop.permute.xlu2 %691  ;;  %v458_v36 = vpop.f32.mrf.mxu2 }
 0x1f1   : > { %v963_v51 = vmul.f32 %v957_v45, %v1374_v54  ;;  %v964_v52 = vmul.f32 %v958_v46, %v1388_v63  ;;  %v696_v0 = vpop.permute.xlu1 %695 }
 0x1f3   : > { %836 = vrot.lane.b32.xlu0 %v827_v38, %s1257_s23  ;;  %838 = vrot.lane.b32.xlu1 %v828_v39, %s1257_s23 }
 0x1f7   : > { %v555_v42 = vpop.permute.xlu0 %554 }
 0x1f8   : > { %v559_v43 = vsel %vm558_vm15, %v553_v40, %v555_v42  ;;  %v769_v3 = vpop.permute.xlu2 %768 }
 0x1f9   : > { %1170 = vmatpush.msk.msrb.mxu2 %vm414_vm8, %v559_v43 }
 0x1fa   : > { %1171 = vmatmul.msk.f32.vlgmr.msrb.gmra.mxu2 %vm410_vm13, %v1169_v61 }
 0x1fb   : > { %895 = vrot.lane.b32.xlu0 %v1374_v54, %s1248_s10  ;;  %897 = vrot.lane.b32.xlu1 %v1388_v63, %s1248_s10  ;;  %v560_v54 = vsel %vm558_vm15, %v555_v42, %v557_v41  ;;  %v1179_v63 = vld [vmem:[%s1533_s3 + $0x20] sm:$0xff] }
 0x1ff   : > { %v633_v48 = vpop.permute.xlu0 %632 }
 0x200   : > { %v637_v49 = vsel %vm636_vm1, %v631_v44, %v633_v48  ;;  %v638_v50 = vsel %vm636_vm1, %v633_v48, %v635_v47  ;;  %v835_v11 = vpop.permute.xlu2 %834 }
 0x201   : > { %1177 = vmatpush.msk.msra.mxu2 %vm414_vm8, %v638_v50 }
 0x202   : > { %1178 = vmatmul.msk.f32.vlgmr.msra.gmra.mxu2 %vm410_vm13, %v1174_v62 }
 0x203   : > { %972 = vrot.lane.b32.xlu0 %v963_v51, %s1259_s25  ;;  %974 = vrot.lane.b32.xlu1 %v964_v52, %s1259_s25 }
 0x208   : > { %v894_v17 = vpop.permute.xlu2 %893 }
 0x20b   : > { %v467_v55 = vpop.permute.xlu0 %466 }
 0x20c   : > { %v471_v56 = vsel %vm470_vm2, %v465_v53, %v467_v55 }
 0x20d   : > { %1165 = vmatpush.msk.msra.mxu3 %vm414_vm8, %v471_v56 }
 0x20e   : > { %1166 = vmatmul.msk.f32.vlgmr.msra.gmra.mxu3 %vm410_vm13, %v407_v57 }
 0x20f   : > { %1172 = vmatpush.msk.msrb.mxu3 %vm414_vm8, %v560_v54 }
 0x210   : > { %v971_v23 = vpop.permute.xlu2 %970 }
 0x213   : > { %v694_v59 = vpop.permute.xlu0 %693 }
 0x214   : > { %v697_v60 = vsel %vm356_vm7, %v692_v58, %v694_v59  ;;  %v698_v5 = vsel %vm356_vm7, %v694_v59, %v696_v0  ;;  %vm1072_vm7 = vcmask 15368  }
 0x215   : > { %1180 = vmatpush.msk.msra.mxu3 %vm414_vm8, %v697_v60 }
 0x216   : > { %1173 = vmatmul.msk.f32.vlgmr.msrb.gmra.mxu3 %vm410_vm13, %v1169_v61 }
 0x21e   : > { %1181 = vmatmul.msk.f32.vlgmr.msra.gmra.mxu3 %vm410_vm13, %v1179_v63 }
 0x255   : > { %v469_v1 = vpop.permute.xlu1 %468 }
 0x256   : > { %v472_v4 = vsel %vm470_vm2, %v467_v55, %v469_v1 }
 0x257   : > { %1167 = vmatpush.msk.msrb.mxu1 %vm414_vm8, %v472_v4 }
 0x258   : > { %1168 = vmatmul.msk.f32.vlgmr.msrb.gmra.mxu1 %vm410_vm13, %v407_v57 }
 0x259   : > { %1175 = vmatpush.msk.msra.mxu1 %vm414_vm8, %v637_v49 }
 0x25b   : > { %1182 = vmatpush.msk.msrb.mxu1 %vm414_vm8, %v698_v5 }
 0x25d   : > { %v771_v6 = vpop.permute.xlu0 %770  ;;  %v773_v7 = vpop.permute.xlu1 %772 }
 0x25e   : > { %v775_v9 = vsel %vm774_vm3, %v769_v3, %v771_v6  ;;  %v776_v10 = vsel %vm774_vm3, %v771_v6, %v773_v7  ;;  %v1260_v6 = vmov 839922192  }
 0x25f   : > { %1185 = vmatpush.msk.msrb.mxu2 %vm414_vm8, %v775_v9  ;;  %1187 = vmatpush.msk.msrb.mxu3 %vm414_vm8, %v776_v10  ;;  %v1054_v7 = vunpack.c.l.s4 %v1260_v6 }
 0x260   : > { %1176 = vmatmul.msk.f32.vlgmr.msra.gmra.mxu1 %vm410_vm13, %v1174_v62  ;;  %1186 = vmatmul.msk.f32.vlgmr.msrb.gmra.mxu2 %vm410_vm13, %v1184_v8 }
 0x261   : > { %1188 = vmatmul.msk.f32.vlgmr.msrb.gmra.mxu3 %vm410_vm13, %v1184_v8  ;;  %v1050_v8 = vpop.xlane.xlu2 %1049  ;;  %v1055_v9 = vunpack.c.0.s8 %v1054_v7 }
 0x262   : > { %v1051_v10 = vmul.f32 0.00390625, %v1050_v8  ;;  %1075 = vst.msk [vmem:[%s1517_s24 + $0x8] sm:$0xf] %vm1074_vm5, %v1050_v8 }
 0x265   : > { %v837_v12 = vpop.permute.xlu0 %836  ;;  %v839_v13 = vpop.permute.xlu1 %838 }
 0x266   : > { %v841_v15 = vsel %vm470_vm2, %v837_v12, %v839_v13  ;;  %v840_v16 = vsel %vm470_vm2, %v835_v11, %v837_v12  ;;  %v1056_v11 = vperm.slane %v1051_v10, %v1055_v9 }
 0x267   : > { %1190 = vmatpush.msk.msrb.mxu0 %vm414_vm8, %v840_v16  ;;  %1192 = vmatpush.msk.msra.mxu1 %vm414_vm8, %v841_v15 }
 0x268   : > { %1183 = vmatmul.msk.f32.vlgmr.msrb.gmra.mxu1 %vm410_vm13, %v1179_v63  ;;  %1191 = vmatmul.msk.f32.vlgmr.msrb.gmra.mxu0 %vm410_vm13, %v1189_v14  ;;  %v1058_v12 = vsub.f32 %v1312_v2, %v1056_v11 }
 0x26a   : > { %v1059_v13 = vmul.f32 %v1058_v12, %v1058_v12 }
 0x26c   : > { %1061 = vst [vmem:[#allocation1] ss:$2 sm:$0xff] %v1059_v13 }
 0x26d   : > { %v896_v18 = vpop.permute.xlu0 %895  ;;  %v898_v19 = vpop.permute.xlu1 %897 }
 0x26e   : > { %v899_v21 = vsel %vm354_vm6, %v894_v17, %v896_v18  ;;  %v900_v22 = vsel %vm354_vm6, %v896_v18, %v898_v19  ;;  %vm1076_vm6 = vcmask 11272  }
 0x26f   : > { %1195 = vmatpush.msk.msra.mxu2 %vm414_vm8, %v899_v21  ;;  %1197 = vmatpush.msk.msra.mxu3 %vm414_vm8, %v900_v22 }
 0x270   : > { %1193 = vmatmul.msk.f32.vlgmr.msra.gmra.mxu1 %vm410_vm13, %v1189_v14  ;;  %1196 = vmatmul.msk.f32.vlgmr.msra.gmra.mxu2 %vm410_vm13, %v1194_v20 }
 0x271   : > { %1198 = vmatmul.msk.f32.vlgmr.msra.gmra.mxu3 %vm410_vm13, %v1194_v20 }
 0x273   : > { %v1062_v14 = vld.sshfl [vmem:[#allocation1] sm:$0xff pattern:$0x75316420]  ;;  %v1063_v15 = vld.sshfl [vmem:[#allocation1 + $0x8] sm:$0xff pattern:$0x75316420] }
 0x274   : > { %v1066_v16 = vsel %vm414_vm8, %v1062_v14, 0.0  ;;  %v1067_v17 = vsel %vm414_vm8, %v1063_v15, 0.0 }
 0x275   : > { %v973_v24 = vpop.permute.xlu0 %972  ;;  %v975_v25 = vpop.permute.xlu1 %974  ;;  %v1068_v18 = vadd.f32 %v1067_v17, %v1066_v16 }
 0x276   : > { %v977_v27 = vsel %vm976_vm4, %v971_v23, %v973_v24  ;;  %v978_v28 = vsel %vm976_vm4, %v973_v24, %v975_v25 }
 0x277   : > { %1200 = vmatpush.msk.msra.mxu0 %vm414_vm8, %v977_v27  ;;  %1202 = vmatpush.msk.msrb.mxu1 %vm414_vm8, %v978_v28 }
 0x278   : > { %1201 = vmatmul.msk.f32.vlgmr.msra.gmra.mxu0 %vm410_vm13, %v1199_v26  ;;  %1203 = vmatmul.msk.f32.vlgmr.msrb.gmra.mxu1 %vm410_vm13, %v1199_v26 }
 0x279   : > { %1069 = vadd.xlane.f32.xlu2 %v1068_v18 }
 0x27d   : > { %v585_v39 = vpop.f32.mrf.mxu2 }
 0x285   : > { %v683_v44 = vpop.f32.mrf.mxu2 }
 0x291   : > { %v497_v35 = vpop.f32.mrf.mxu3 }
 0x292   : > { %v498_v41 = vadd.f32 %v497_v35, %v438_v29 }
 0x294   : > { %v608_v46 = vadd.f32 %v585_v39, %v498_v41 }
 0x299   : > { %v605_v38 = vpop.f32.mrf.mxu3 }
 0x2a1   : > { %v723_v42 = vpop.f32.mrf.mxu3 }
 0x2d5   : > { %v517_v37 = vpop.f32.mrf.mxu1 }
 0x2d6   : > { %v518_v43 = vadd.f32 %v517_v37, %v458_v36 }
 0x2d8   : > { %v609_v47 = vadd.f32 %v605_v38, %v518_v43 }
 0x2da   : > { %v687_v49 = vadd.f32 %v683_v44, %v609_v47 }
 0x2dd   : > { %v663_v40 = vpop.f32.mrf.mxu1 }
 0x2de   : > { %v686_v48 = vadd.f32 %v663_v40, %v608_v46 }
 0x2e0   : > { %v746_v51 = vadd.f32 %v723_v42, %v686_v48 }
 0x2e3   : > { %v801_v50 = vpop.f32.mrf.mxu2 }
 0x2e4   : > { %v821_v52 = vpop.f32.mrf.mxu3  ;;  %v824_v57 = vadd.f32 %v801_v50, %v746_v51 }
 0x2e5   : > { %v743_v45 = vpop.f32.mrf.mxu1  ;;  %v866_v55 = vpop.f32.mrf.mxu0 }
 0x2e6   : > { %v747_v53 = vadd.f32 %v743_v45, %v687_v49  ;;  %v889_v58 = vadd.f32 %v866_v55, %v824_v57 }
 0x2e8   : > { %v825_v54 = vadd.f32 %v821_v52, %v747_v53 }
 0x2ec   : > { %v1070_v25 = vpop.xlane.xlu2 %1069 }
 0x2ed   : > { %v886_v56 = vpop.f32.mrf.mxu1  ;;  %1077 = vst.msk [vmem:[%s1517_s24 + $0x8] sm:$0xf] %vm1076_vm6, %v1070_v25 }
 0x2ee   : > { %v890_v59 = vadd.f32 %v886_v56, %v825_v54 }
 0x2f3   : > { %v925_v60 = vpop.f32.mrf.mxu2 }
 0x2f4   : > { %v948_v61 = vadd.f32 %v925_v60, %v889_v58  ;;  %v945_v62 = vpop.f32.mrf.mxu3 }
 0x2f5   : > { %v949_v63 = vadd.f32 %v945_v62, %v890_v59  ;;  %v1003_v0 = vpop.f32.mrf.mxu0  ;;  %v1023_v1 = vpop.f32.mrf.mxu1 }
 0x2f6   : > { %v1026_v3 = vadd.f32 %v1003_v0, %v948_v61 }
 0x2f7   : > { %v1027_v4 = vadd.f32 %v1023_v1, %v949_v63 }
 0x2f9   : > { %v1029_v5 = vadd.f32 %v1027_v4, %v1026_v3 }
 0x2fb   : > { %1030 = vadd.xlane.f32.xlu0 %v1029_v5 }
 0x36e   : > { %v1031_v19 = vpop.xlane.xlu0 %1030 }
 0x36f   : > { %v1032_v20 = vmul.f32 0.00390625, %v1031_v19  ;;  %1071 = vst.msk [vmem:[%s1517_s24] sm:$0xff] %vm538_vm9, %v1031_v19 }
 0x371   : > { %v1033_v21 = vsub.f32 %v1026_v3, %v1032_v20  ;;  %v1034_v22 = vsub.f32 %v1027_v4, %v1032_v20 }
 0x373   : > { %v1035_v23 = vmul.f32 %v1033_v21, %v1033_v21  ;;  %v1036_v2 = vmul.f32 %v1034_v22, %v1034_v22 }
 0x375   : > { %v1037_v24 = vadd.f32 %v1036_v2, %v1035_v23 }
 0x377   : > { %1038 = vadd.xlane.f32.xlu1 %v1037_v24 }
 0x3ea   : > { %v1039_v26 = vpop.xlane.xlu1 %1038 }
 0x3eb   : > { %1073 = vst.msk [vmem:[%s1517_s24] sm:$0xff] %vm1072_vm7, %v1039_v26 }
 0x3ec PF: > { %s15_s18 = sadd.s32 1, %s1241_s18  }
 0x3ed   : > { %p12_p4 = scmp.ge.s32.totalorder %s15_s18, 4  }
 0x3ef   :  { %14 = sbr.rel (!%p12_p4) target bundleno = 1 (0x1), region = 81 }

</bundles_post_ra>
